<compile_context>
chip_gen: v7x
topology: tpu7x:2x2x1
jax: 0.10.0
libtpu: 0.0.40
codegen_flags: <defaults>
</compile_context>

<pallas_src>
import functools

import jax
import jax.numpy as jnp
from jax.experimental import pallas as pl
from jax.experimental.pallas import tpu as pltpu

_LANE = 128          # vreg lane width (last dim)
_SUBLANE_BF16 = 16   # bf16 sublane packing (rows per vreg) -> pad batch to 16


def _round_up(n, m):
    return ((n + m - 1) // m) * m


def _choose_batch_tiling(batch):
    """Pick (batch_tile, batch_pad): 16-row padding, <~12.5% round-up waste, and >=2
    parallel grid blocks once the batch spans more than one 128-row tile (v7x megacore)."""
    b = _round_up(max(int(batch), _SUBLANE_BF16), _SUBLANE_BF16)
    tile = _SUBLANE_BF16
    for cand in (512, 256, 128, 64, 32, 16):
        if cand > b:
            continue
        padded = _round_up(b, cand)
        if (padded - b) * 8 <= padded:      # keep dead rows under ~12.5%
            tile = cand
            break
    batch_pad = _round_up(b, tile)
    if batch_pad // tile == 1 and tile >= 256:
        tile //= 2                          # give the second v7x TensorCore a block
    return tile, batch_pad


def _apply_activation(y, act):
    """Post-matmul activation in f32 (VPU/EUP)."""
    if act is None:
        return y
    if act == "relu":
        return jnp.maximum(y, 0.0)
    if act == "tanh":
        return jnp.tanh(y)                              # EUP
    if act == "sigmoid":
        return 1.0 / (1.0 + jnp.exp(-y))                # exact (approx recip can miss tol)
    raise ValueError(f"unsupported activation: {act!r}")


def _fused_mlp_kernel(x_ref, *refs, activations):
    """Fused MLP over one batch tile.

    x_ref:                 (Bt, F0)                        f32 VMEM (unpadded features)
    refs[2l], refs[2l+1]:  (Kl, Fl+1_pad) bf16, (1, Fl+1_pad) f32   weights / bias
    refs[-1]:              (Bt, FL_pad)                    f32 output VMEM

    The layer loop is unrolled at trace time; intermediate activations stay in VMEM/vregs
    (never written back to HBM).  Padded weight rows/cols are zero, so padded lanes never
    contaminate real outputs.
    """
    o_ref = refs[-1]
    wb_refs = refs[:-1]

    h = x_ref[...]                                      # f32
    for l, act in enumerate(activations):
        w = wb_refs[2 * l][...]                         # bf16, MXU-native
        b = wb_refs[2 * l + 1][...]                     # f32
        y = jnp.dot(h.astype(jnp.bfloat16), w,
                    preferred_element_type=jnp.float32) + b
        h = _apply_activation(y, act)
    o_ref[...] = h.astype(o_ref.dtype)


def fused_mlp_forward(x, weights, biases, activations, batch_tile):
    """Single pallas_call running the whole MLP; batch tiled on a 'parallel' grid axis."""
    batch_pad, in_dim = x.shape
    out_pad = weights[-1].shape[1]
    assert batch_pad % batch_tile == 0
    n_blocks = batch_pad // batch_tile

    in_specs = [pl.BlockSpec((batch_tile, in_dim), lambda i: (i, 0))]
    flat_params = []
    param_bytes = 0
    for w, b in zip(weights, biases):
        k, n = w.shape
        # Constant index_map -> fetched once; Buffered(1) = single VMEM buffer (no
        # pointless double-buffering of parameters).
        in_specs.append(pl.BlockSpec((k, n), lambda i: (0, 0),
                                     pipeline_mode=pl.Buffered(1)))
        in_specs.append(pl.BlockSpec((1, n), lambda i: (0, 0),
                                     pipeline_mode=pl.Buffered(1)))
        flat_params += [w, b]
        param_bytes += w.size * w.dtype.itemsize + b.size * b.dtype.itemsize

    # Params once + double-buffered x/out tiles + slack; keep at least the default 32 MiB.
    act_bytes = 2 * batch_tile * (in_dim + out_pad) * 4
    vmem_limit = min(max(param_bytes + act_bytes + (8 << 20), 32 << 20), 128 << 20)

    kernel = functools.partial(_fused_mlp_kernel, activations=tuple(activations))
    return pl.pallas_call(
        kernel,
        out_shape=jax.ShapeDtypeStruct((batch_pad, out_pad), jnp.float32),
        grid_spec=pltpu.PrefetchScalarGridSpec(
            num_scalar_prefetch=0,
            grid=(n_blocks,),
            in_specs=in_specs,
            out_specs=pl.BlockSpec((batch_tile, out_pad), lambda i: (i, 0)),
        ),
        compiler_params=pltpu.CompilerParams(
            dimension_semantics=("parallel",),
            vmem_limit_bytes=vmem_limit,
        ),
    )(x, *flat_params)


class NetPallas:
    """JAX/Pallas equivalent of the PyTorch Net module (MLP with per-layer activations)."""

    def __init__(self, input_size, hidden_size, output_size, activator, key):
        assert len(hidden_size) == len(activator)
        self.input_size = int(input_size)
        self.output_size = int(output_size)
        self.activations = tuple(activator) + (None,)   # final Linear has no activation

        dims = [self.input_size] + list(hidden_size) + [self.output_size]
        out_pads = [_round_up(d, _LANE) for d in dims]  # lane-dense layer-output dims
        self.out_pad = out_pads[-1]

        self.params = []       # f32 unpadded (W_t, b) for the pure-JAX reference
        self.params_pad = []   # (bf16 W_t padded-on-N, f32 bias padded) for the kernel
        for li in range(len(dims) - 1):
            f_in, f_out = dims[li], dims[li + 1]
            key, wk, bk = jax.random.split(key, 3)
            # Mimic torch.nn.Linear default init: U(-1/sqrt(fan_in), 1/sqrt(fan_in))
            bound = 1.0 / (f_in ** 0.5)
            w = jax.random.uniform(wk, (f_out, f_in), jnp.float32, -bound, bound)
            b = jax.random.uniform(bk, (f_out,), jnp.float32, -bound, bound)
            w_t = w.T                                    # (f_in, f_out) lane-dense layout
            self.params.append((w_t, b))

            # First layer keeps the true (unpadded) K so x needs no feature padding;
            # later layers pad K to the previous layer's padded output (zero rows).
            k_dim = f_in if li == 0 else out_pads[li]
            n_pad = out_pads[li + 1]
            w_pad = jnp.zeros((k_dim, n_pad), jnp.float32).at[:f_in, :f_out].set(w_t)
            w_pad = w_pad.astype(jnp.bfloat16)           # MXU-native; halves VMEM/DMA
            b_pad = jnp.zeros((1, n_pad), jnp.float32).at[0, :f_out].set(b)
            self.params_pad.append((w_pad, b_pad))

        self._jit_forward = jax.jit(self._forward)

    def _forward(self, x):
        batch = x.shape[0]
        batch_tile, batch_pad = _choose_batch_tiling(batch)
        if batch_pad != batch:
            x_in = jnp.zeros((batch_pad, self.input_size), x.dtype).at[:batch].set(x)
        else:
            x_in = x

        ws = [w for w, _ in self.params_pad]
        bs = [b for _, b in self.params_pad]
        out_pad = fused_mlp_forward(x_in, ws, bs, self.activations, batch_tile)
        # TODO(synk): keep activations 128-padded end-to-end across calls to drop this
        #             slice (and the batch pad above) and save an HBM round-trip.
        return out_pad[:batch, :self.output_size]

    def __call__(self, x):
        return self._jit_forward(x)

    def reference(self, x):
        """Pure-JAX f32 reference (unpadded params) for correctness check."""
        h = x
        for (w_t, b), act in zip(self.params, self.activations):
            h = h @ w_t + b
            if act == "relu":
                h = jnp.maximum(h, 0.0)
            elif act == "tanh":
                h = jnp.tanh(h)
            elif act == "sigmoid":
                h = jax.nn.sigmoid(h)
        return h


if __name__ == "__main__":
    key = jax.random.PRNGKey(0)
    key, xk, pk = jax.random.split(key, 3)

    batch = 8
    input_size = 16
    hidden_size = [32, 32]
    output_size = 8
    activator = ["tanh", "relu"]   # corresponds to nn.Tanh(), nn.ReLU() instances

    net = NetPallas(input_size, hidden_size, output_size, activator, pk)

    x = jax.random.normal(xk, (batch, input_size), jnp.float32)

    out = jax.block_until_ready(net(x))
    ref = net.reference(x)

    assert out.shape == (batch, output_size)
    # bf16 MXU inputs with f32 accumulation -> looser tolerance than a pure-f32 check.
    assert jnp.allclose(out, ref, atol=2e-2, rtol=2e-2), "mismatch vs reference"

    print("KERNEL_OK")
</pallas_src>

<mosaic_0001>
module attributes {stable_mosaic.version = 11 : i64} {
  func.func @_fused_mlp_kernel(%arg0: i32, %arg1: memref<16x16xf32, #tpu.memory_space<vmem>>, %arg2: memref<16x128xbf16, #tpu.memory_space<vmem>>, %arg3: memref<1x128xf32, #tpu.memory_space<vmem>>, %arg4: memref<128x128xbf16, #tpu.memory_space<vmem>>, %arg5: memref<1x128xf32, #tpu.memory_space<vmem>>, %arg6: memref<128x128xbf16, #tpu.memory_space<vmem>>, %arg7: memref<1x128xf32, #tpu.memory_space<vmem>>, %arg8: memref<16x128xf32, #tpu.memory_space<vmem>>) attributes {dimension_semantics = [#tpu.dimension_semantics<parallel>], iteration_bounds = array<i64: 1>, scalar_prefetch = 0 : i64, scratch_operands = 0 : i64, tpu.core_type = #tpu.core_type<tc>, window_params = [{transform_indices = @transform_0, window_bounds = array<i64: 16, 16>}, {pipeline_mode = #tpu.pipeline_mode<synchronous>, transform_indices = @transform_1, window_bounds = array<i64: 16, 128>}, {pipeline_mode = #tpu.pipeline_mode<synchronous>, transform_indices = @transform_2, window_bounds = array<i64: 1, 128>}, {pipeline_mode = #tpu.pipeline_mode<synchronous>, transform_indices = @transform_3, window_bounds = array<i64: 128, 128>}, {pipeline_mode = #tpu.pipeline_mode<synchronous>, transform_indices = @transform_4, window_bounds = array<i64: 1, 128>}, {pipeline_mode = #tpu.pipeline_mode<synchronous>, transform_indices = @transform_5, window_bounds = array<i64: 128, 128>}, {pipeline_mode = #tpu.pipeline_mode<synchronous>, transform_indices = @transform_6, window_bounds = array<i64: 1, 128>}, {transform_indices = @transform_7, window_bounds = array<i64: 16, 128>}]} {
    %c0 = arith.constant 0 : index
    %c0_0 = arith.constant 0 : index
    %0 = vector.load %arg1[%c0, %c0_0] : memref<16x16xf32, #tpu.memory_space<vmem>>, vector<16x16xf32>
    %c0_1 = arith.constant 0 : index
    %c0_2 = arith.constant 0 : index
    %1 = vector.load %arg2[%c0_1, %c0_2] : memref<16x128xbf16, #tpu.memory_space<vmem>>, vector<16x128xbf16>
    %c0_3 = arith.constant 0 : index
    %c0_4 = arith.constant 0 : index
    %2 = vector.load %arg3[%c0_3, %c0_4] : memref<1x128xf32, #tpu.memory_space<vmem>>, vector<1x128xf32>
    %3 = arith.truncf %0 : vector<16x16xf32> to vector<16x16xbf16>
    %cst = arith.constant dense<0.000000e+00> : vector<16x128xf32>
    %4 = tpu.matmul %3, %1, %cst {dimension_numbers = #tpu.dot_dimension_numbers<[1], [0], [0], [1], [0, 0, 1, 1], [], []>} : vector<16x16xbf16>, vector<16x128xbf16>, vector<16x128xf32> -> vector<16x128xf32>
    %5 = vector.broadcast %2 : vector<1x128xf32> to vector<16x128xf32>
    %6 = arith.addf %4, %5 : vector<16x128xf32>
    %7 = math.tanh %6 : vector<16x128xf32>
    %c0_5 = arith.constant 0 : index
    %c0_6 = arith.constant 0 : index
    %8 = vector.load %arg4[%c0_5, %c0_6] : memref<128x128xbf16, #tpu.memory_space<vmem>>, vector<128x128xbf16>
    %c0_7 = arith.constant 0 : index
    %c0_8 = arith.constant 0 : index
    %9 = vector.load %arg5[%c0_7, %c0_8] : memref<1x128xf32, #tpu.memory_space<vmem>>, vector<1x128xf32>
    %10 = arith.truncf %7 : vector<16x128xf32> to vector<16x128xbf16>
    %cst_9 = arith.constant dense<0.000000e+00> : vector<16x128xf32>
    %11 = tpu.matmul %10, %8, %cst_9 {dimension_numbers = #tpu.dot_dimension_numbers<[1], [0], [0], [1], [0, 0, 1, 1], [], []>} : vector<16x128xbf16>, vector<128x128xbf16>, vector<16x128xf32> -> vector<16x128xf32>
    %12 = vector.broadcast %9 : vector<1x128xf32> to vector<16x128xf32>
    %13 = arith.addf %11, %12 : vector<16x128xf32>
    %cst_10 = arith.constant 0.000000e+00 : f32
    %14 = vector.broadcast %cst_10 : f32 to vector<16x128xf32>
    %15 = arith.maximumf %13, %14 : vector<16x128xf32>
    %c0_11 = arith.constant 0 : index
    %c0_12 = arith.constant 0 : index
    %16 = vector.load %arg6[%c0_11, %c0_12] : memref<128x128xbf16, #tpu.memory_space<vmem>>, vector<128x128xbf16>
    %c0_13 = arith.constant 0 : index
    %c0_14 = arith.constant 0 : index
    %17 = vector.load %arg7[%c0_13, %c0_14] : memref<1x128xf32, #tpu.memory_space<vmem>>, vector<1x128xf32>
    %18 = arith.truncf %15 : vector<16x128xf32> to vector<16x128xbf16>
    %cst_15 = arith.constant dense<0.000000e+00> : vector<16x128xf32>
    %19 = tpu.matmul %18, %16, %cst_15 {dimension_numbers = #tpu.dot_dimension_numbers<[1], [0], [0], [1], [0, 0, 1, 1], [], []>} : vector<16x128xbf16>, vector<128x128xbf16>, vector<16x128xf32> -> vector<16x128xf32>
    %20 = vector.broadcast %17 : vector<1x128xf32> to vector<16x128xf32>
    %21 = arith.addf %19, %20 : vector<16x128xf32>
    %c0_16 = arith.constant 0 : index
    %c0_17 = arith.constant 0 : index
    %22 = vector.load %arg8[%c0_16, %c0_17] : memref<16x128xf32, #tpu.memory_space<vmem>>, vector<16x128xf32>
    tpu.vector_store %arg8[%c0_16, %c0_17], %21 {strides = array<i32>} : memref<16x128xf32, #tpu.memory_space<vmem>>, vector<16x128xf32>,
    return
  }
  func.func @transform_0(%arg0: i32) -> (i32, i32) {
    %c0_i32 = arith.constant 0 : i32
    %c0_i32_0 = arith.constant 0 : i32
    return %arg0, %c0_i32 : i32, i32
  }
  func.func @transform_1(%arg0: i32) -> (i32, i32) {
    %c0_i32 = arith.constant 0 : i32
    %c0_i32_0 = arith.constant 0 : i32
    %c0_i32_1 = arith.constant 0 : i32
    return %c0_i32, %c0_i32_0 : i32, i32
  }
  func.func @transform_2(%arg0: i32) -> (i32, i32) {
    %c0_i32 = arith.constant 0 : i32
    %c0_i32_0 = arith.constant 0 : i32
    %c0_i32_1 = arith.constant 0 : i32
    return %c0_i32, %c0_i32_0 : i32, i32
  }
  func.func @transform_3(%arg0: i32) -> (i32, i32) {
    %c0_i32 = arith.constant 0 : i32
    %c0_i32_0 = arith.constant 0 : i32
    %c0_i32_1 = arith.constant 0 : i32
    return %c0_i32, %c0_i32_0 : i32, i32
  }
  func.func @transform_4(%arg0: i32) -> (i32, i32) {
    %c0_i32 = arith.constant 0 : i32
    %c0_i32_0 = arith.constant 0 : i32
    %c0_i32_1 = arith.constant 0 : i32
    return %c0_i32, %c0_i32_0 : i32, i32
  }
  func.func @transform_5(%arg0: i32) -> (i32, i32) {
    %c0_i32 = arith.constant 0 : i32
    %c0_i32_0 = arith.constant 0 : i32
    %c0_i32_1 = arith.constant 0 : i32
    return %c0_i32, %c0_i32_0 : i32, i32
  }
  func.func @transform_6(%arg0: i32) -> (i32, i32) {
    %c0_i32 = arith.constant 0 : i32
    %c0_i32_0 = arith.constant 0 : i32
    %c0_i32_1 = arith.constant 0 : i32
    return %c0_i32, %c0_i32_0 : i32, i32
  }
  func.func @transform_7(%arg0: i32) -> (i32, i32) {
    %c0_i32 = arith.constant 0 : i32
    %c0_i32_0 = arith.constant 0 : i32
    return %arg0, %c0_i32 : i32, i32
  }
}

</mosaic_0001>

<bundles_post_ra>
// kernel: _forward.1
= control target key start
LH: loop header
LB: loop body
LE: loop exit
PB: predicated region body
PF: predicated region fallthrough
CT: control target
= control target key end

     0   :  { %12 = vsyncpa [#allocation3], 0  ;;  %s635_s0 = inlined_call_operand.vmem [shape: f32[16,16], index: 0, kind: input, shape index: {}]   ;;  %s636_s1 = inlined_call_operand.vmem [shape: bf16[16,128], index: 1, kind: input, shape index: {}]   ;;  %s637_s2 = inlined_call_operand.vmem [shape: f32[1,128], index: 2, kind: input, shape index: {}]   ;;  %s638_s3 = inlined_call_operand.hbm [shape: bf16[128,128], index: 3, kind: input, shape index: {}]   ;;  %s639_s4 = inlined_call_operand.vmem [shape: f32[1,128], index: 4, kind: input, shape index: {}]   ;;  %s640_s5 = inlined_call_operand.hbm [shape: bf16[128,128], index: 5, kind: input, shape index: {}]   ;;  %s641_s6 = inlined_call_operand.vmem [shape: f32[1,128], index: 6, kind: input, shape index: {}]   ;;  %s642_s7 = inlined_call_operand.vmem [shape: f32[16,128], index: 7, kind: output, shape index: {}]  }
   0x1   :  { %13 = vsyncpa [#allocation5], 0  ;;  %s518_s24 = smov [#allocation2]   ;;  %s470_s28 = scalar_lea.hbm %s638_s3, 1024 }
   0x2   :  { %s25_s25 = sshll.u32 %s518_s24, 4  ;;  %p471_p0 = scmp.ne.s32.totalorder %s638_s3, %s470_s28  ;;  %s26_s25 = int_to_ptr.vmem [resolvable:$true] %s25_s25 }
   0x3   :  { %p474_p1 = scmp.lt.u32.totalorder %s470_s28, %s638_s3 }
   0x5   :  { %p476_p2 = pnand %p474_p1, %p471_p0 }
   0x7   :  { %479 = shalt.err (!%p476_p2)
}
   0x8   :  { %s480_s10 = scalar_lea.vmem %s26_s25, 1024  ;;  %p485_p4 = scmp.lt.s32.totalorder %s26_s25, %s26_s25 }
   0x9   :  { %p481_p3 = scmp.ne.s32.totalorder %s26_s25, %s480_s10  ;;  %p486_p5 = scmp.lt.s32.totalorder %s480_s10, %s480_s10 }
   0xb   :  { %p487_p6 = por %p486_p5, %p485_p4 }
   0xd   :  { %p488_p7 = pnand %p487_p6, %p481_p3 }
   0xf   :  { %491 = shalt.err (!%p488_p7)
}
  0x10   :  { %s519_s11 = smov 64   ;;  %s520_s12 = smov 4  }
  0x11   :  { %31 = dma.hbm_to_vmem [thread:$0]  %s638_s3, 1024, %s26_s25, [#allocation3], %s519_s11, %s519_s11, %s520_s12  }
  0x12   :  { %s521_s15 = smov [#allocation4]   ;;  %s492_s19 = scalar_lea.hbm %s640_s5, 1024 }
  0x13   :  { %s39_s16 = sshll.u32 %s521_s15, 4  ;;  %p493_p8 = scmp.ne.s32.totalorder %s640_s5, %s492_s19  ;;  %s40_s16 = int_to_ptr.vmem [resolvable:$true] %s39_s16 }
  0x14   :  { %p496_p9 = scmp.lt.u32.totalorder %s492_s19, %s640_s5 }
  0x16   :  { %p498_p10 = pnand %p496_p9, %p493_p8 }
  0x18   :  { %501 = shalt.err (!%p498_p10)
}
  0x19   :  { %s502_s24 = scalar_lea.vmem %s40_s16, 1024  ;;  %p507_p12 = scmp.lt.s32.totalorder %s40_s16, %s40_s16 }
  0x1a   :  { %p503_p11 = scmp.ne.s32.totalorder %s40_s16, %s502_s24  ;;  %p508_p13 = scmp.lt.s32.totalorder %s502_s24, %s502_s24 }
  0x1c   :  { %p509_p0 = por %p508_p13, %p507_p12 }
  0x1e   :  { %p510_p1 = pnand %p509_p0, %p503_p11 }
  0x20   :  { %513 = shalt.err (!%p510_p1)
}
  0x21   :  { %45 = dma.hbm_to_vmem [thread:$0]  %s640_s5, 1024, %s40_s16, [#allocation5], %s519_s11, %s519_s11, %s520_s12  }
  0x22   :  { %514 = dma.done.wait [#allocation3], 1024  }
  0x23   :  { %515 = vsyncadd [#allocation3], 4294966272 }
  0x24   :  { %516 = dma.done.wait [#allocation5], 1024  }
  0x25   :  { %517 = vsyncadd [#allocation5], 4294966272  ;;  %v522_v0 = vmov 0.0   ;;  %vm523_vm0 = vmmov 0   ;;  %v449_v1 = vld [vmem:[%s636_s1] sm:$0xff]   ;;  %v56_v3 = vld [vmem:[%s635_s0 + $0x8] sm:$0xff] }
  0x26   :  { %397 = vmatprep.subr.bf16.mxu0 %v522_v0  ;;  %399 = vmatprep.mubr.msk.bf16.mxu0 %vm523_vm0, %v522_v0  ;;  %v55_v2 = vld [vmem:[%s635_s0] sm:$0xff]  ;;  %vm73_vm1 = vcmask 130048   ;;  %v451_v6 = vld [vmem:[#allocation2 + $0x8] sm:$0xff]   ;;  %v452_v7 = vld [vmem:[#allocation2 + $0x10] sm:$0xff]  }
  0x27   :  { %403 = vmatprep.subr.bf16.mxu1 %v522_v0  ;;  %419 = vmatprep.mubr.msk.bf16.mxu1 %vm523_vm0, %v522_v0  ;;  %v60_v4 = vpack.c.bf16 %v56_v3, %v55_v2  ;;  %v450_v5 = vld [vmem:[#allocation2] sm:$0xff]   ;;  %v453_v8 = vld [vmem:[#allocation2 + $0x18] sm:$0xff]   ;;  %v455_v10 = vld [vmem:[#allocation2 + $0x28] sm:$0xff]  }
  0x28   :  { %398 = vmatpush3.bf16.msra.mxu0 %v449_v1  ;;  %404 = vmatpush3.bf16.msra.mxu1 %v450_v5  ;;  %v454_v9 = vld [vmem:[#allocation2 + $0x20] sm:$0xff]   ;;  %v456_v11 = vld [vmem:[#allocation2 + $0x30] sm:$0xff]   ;;  %v457_v12 = vld [vmem:[#allocation2 + $0x38] sm:$0xff]  }
  0x29   :  { %423 = vmatprep.subr.bf16.mxu0 %v522_v0  ;;  %405 = vmatprep.subr.bf16.mxu1 %v522_v0  ;;  %v458_v13 = vld [vmem:[#allocation4] sm:$0xff]   ;;  %v459_v14 = vld [vmem:[#allocation4 + $0x8] sm:$0xff]   ;;  %v460_v15 = vld [vmem:[#allocation4 + $0x10] sm:$0xff]  }
  0x2a   :  { %v461_v16 = vld [vmem:[#allocation4 + $0x18] sm:$0xff]   ;;  %v462_v17 = vld [vmem:[#allocation4 + $0x20] sm:$0xff]   ;;  %v463_v18 = vld [vmem:[#allocation4 + $0x28] sm:$0xff]  }
  0x2b   :  { %400 = vmatmul.mubr.msk.bf16.vlgmr.msra.gmra.mrb[0].mxu0 %vm73_vm1, %v60_v4  ;;  %v356_v19 = vld [vmem:[%s637_s2] ss:$0 sm:$0xff]  ;;  %v464_v29 = vld [vmem:[#allocation4 + $0x30] sm:$0xff]   ;;  %v465_v30 = vld [vmem:[#allocation4 + $0x38] sm:$0xff]  }
  0x2c   :  { %439 = vmatprep.mubr.msk.bf16.mxu0 %vm523_vm0, %v522_v0  ;;  %406 = vmatpush3.bf16.msra.mxu1 %v451_v6  ;;  %v359_v31 = vld [vmem:[%s639_s4] ss:$0 sm:$0xff] }
  0x2d   :  { %407 = vmatprep.subr.bf16.mxu1 %v522_v0  ;;  %424 = vmatpush3.bf16.msra.mxu0 %v458_v13  ;;  %v368_v41 = vld [vmem:[%s641_s6] ss:$0 sm:$0xff] }
  0x2e   :  { %425 = vmatprep.subr.bf16.mxu0 %v522_v0 }
  0x30   :  { %408 = vmatpush3.bf16.msra.mxu1 %v452_v7 }
  0x31   :  { %409 = vmatprep.subr.bf16.mxu1 %v522_v0  ;;  %426 = vmatpush3.bf16.msra.mxu0 %v459_v14 }
  0x32   :  { %427 = vmatprep.subr.bf16.mxu0 %v522_v0 }
  0x34   :  { %410 = vmatpush3.bf16.msra.mxu1 %v453_v8 }
  0x35   :  { %411 = vmatprep.subr.bf16.mxu1 %v522_v0  ;;  %428 = vmatpush3.bf16.msra.mxu0 %v460_v15 }
  0x36   :  { %429 = vmatprep.subr.bf16.mxu0 %v522_v0 }
  0x38   :  { %412 = vmatpush3.bf16.msra.mxu1 %v454_v9 }
  0x39   :  { %413 = vmatprep.subr.bf16.mxu1 %v522_v0  ;;  %430 = vmatpush3.bf16.msra.mxu0 %v461_v16 }
  0x3a   :  { %431 = vmatprep.subr.bf16.mxu0 %v522_v0 }
  0x3c   :  { %414 = vmatpush3.bf16.msra.mxu1 %v455_v10 }
  0x3d   :  { %415 = vmatprep.subr.bf16.mxu1 %v522_v0  ;;  %432 = vmatpush3.bf16.msra.mxu0 %v462_v17 }
  0x3e   :  { %433 = vmatprep.subr.bf16.mxu0 %v522_v0 }
  0x40   :  { %416 = vmatpush3.bf16.msra.mxu1 %v456_v11 }
  0x41   :  { %417 = vmatprep.subr.bf16.mxu1 %v522_v0  ;;  %434 = vmatpush3.bf16.msra.mxu0 %v463_v18 }
  0x42   :  { %435 = vmatprep.subr.bf16.mxu0 %v522_v0 }
  0x44   :  { %418 = vmatpush3.bf16.msra.mxu1 %v457_v12 }
  0x45   :  { %436 = vmatpush3.bf16.msra.mxu0 %v464_v29 }
  0x46   :  { %437 = vmatprep.subr.bf16.mxu0 %v522_v0 }
  0x49   :  { %438 = vmatpush3.bf16.msra.mxu0 %v465_v30 }
  0xfe   :  { %v111_v20 = vpop.f32.mrb[0].mxu0 }
  0xff   :  { %v112_v21 = vadd.f32 %v356_v19, %v111_v20  ;;  %v401_v22 = vpop.f32.mrb[1].mxu0 }
 0x100   :  { %v114_v23 = vpop.f32.mrb[2].mxu0 }
 0x101   :  { %v115_v24 = vadd.f32 %v356_v19, %v114_v23  ;;  %v402_v25 = vpop.f32.mrb[3].mxu0  ;;  %466 = vtanh.f32 %v112_v21 }
 0x103   :  { %468 = vtanh.f32 %v115_v24 }
 0x10b   :  { %v467_v26 = vpop.eup %466 }
 0x10d   :  { %v469_v27 = vpop.eup %468 }
 0x10e   :  { %v137_v28 = vpack.c.bf16 %v469_v27, %v467_v26 }
 0x110   :  { %420 = vmatmul.mubr.bf16.vlgmr.msra.gmra.mrb[0].mxu1 %v137_v28 }
 0x1e3   :  { %v226_v32 = vpop.f32.mrb[0].mxu1 }
 0x1e4   :  { %v227_v33 = vadd.f32 %v359_v31, %v226_v32  ;;  %v421_v34 = vpop.f32.mrb[1].mxu1 }
 0x1e5   :  { %v229_v35 = vpop.f32.mrb[2].mxu1 }
 0x1e6   :  { %v230_v36 = vadd.f32 %v359_v31, %v229_v35  ;;  %v422_v37 = vpop.f32.mrb[3].mxu1  ;;  %v233_v38 = vmax.f32 %v227_v33, 0.0 }
 0x1e8   :  { %v234_v39 = vmax.f32 %v230_v36, 0.0 }
 0x1ea   :  { %v252_v40 = vpack.c.bf16 %v234_v39, %v233_v38 }
 0x1ec   :  { %440 = vmatmul.mubr.bf16.vlgmr.msra.gmra.mrb[4].mxu0 %v252_v40 }
 0x2bf   :  { %v341_v42 = vpop.f32.mrb[4].mxu0 }
 0x2c0   :  { %v342_v43 = vadd.f32 %v368_v41, %v341_v42  ;;  %v441_v44 = vpop.f32.mrb[5].mxu0 }
 0x2c1   :  { %v344_v45 = vpop.f32.mrb[6].mxu0 }
 0x2c2   :  { %348 = vst [vmem:[%s642_s7] sm:$0xff] %v342_v43  ;;  %v345_v46 = vadd.f32 %v368_v41, %v344_v45  ;;  %v442_v47 = vpop.f32.mrb[7].mxu0 }
 0x2c4   :  { %349 = vst [vmem:[%s642_s7 + $0x8] sm:$0xff] %v345_v46 }
 0x2c5   :  { %354 = vsyncpa [#allocation3], 1 }
 0x2c6   :  { %355 = vsyncpa [#allocation5], 1 }

</bundles_post_ra>
